<compile_context>
chip_gen: v7x
topology: tpu7x:2x2x1
jax: 0.10.0
libtpu: 0.0.40
codegen_flags: <defaults>
</compile_context>

<pallas_src>
import numpy as np
import jax
import jax.numpy as jnp
from jax import lax
from jax.experimental import pallas as pl
from jax.experimental.pallas import tpu as pltpu


def _build_weight(batch_size: int, sampling_num: int) -> np.ndarray:
    """Reference weight construction mirroring WeightMSELoss.__init__ (vectorized)."""
    per_item = np.concatenate(
        [np.zeros((1,), np.float32),
         np.arange(sampling_num, 0, -1, dtype=np.float32)])
    w = np.tile(per_item, batch_size).astype(np.float32)
    return w / np.sum(w)


class WeightedRankingLossPallas:
    """JAX/Pallas equivalent of the PyTorch WeightedRankingLoss module (forward only)."""

    # Below this many elements the whole problem is one block / one DMA per operand.
    _SINGLE_BLOCK_MAX_N = 2048

    def __init__(self, batch_size: int, sampling_num: int, max_chunk_rows: int = 2048):
        self.batch_size = batch_size
        self.sampling_num = sampling_num
        self.period = sampling_num + 1                      # elements per batch item
        self.n = batch_size * self.period

        # Analytic normalizer: sum of weights = B * S*(S+1)/2 (exact integer).
        total = batch_size * sampling_num * (sampling_num + 1) / 2.0
        self.inv_total = np.float32(1.0 / total)

        # Kept only for reference / external inspection (NOT fed to the kernel).
        self.weight = jnp.asarray(_build_weight(batch_size, sampling_num))

        if self.n <= self._SINGLE_BLOCK_MAX_N:
            self._loss_fn = jax.jit(self._make_single_block_fn())
        else:
            rows = -(-self.n // 128)                        # ceil(n / 128)
            rows8 = -(-rows // 8) * 8                       # sublane-align
            chunk_rows = max(8, min(rows8, (max_chunk_rows // 8) * 8))
            r_pad = -(-rows8 // chunk_rows) * chunk_rows    # grid divides evenly
            self.chunk_rows = chunk_rows
            self.r_pad = r_pad
            self.num_chunks = r_pad // chunk_rows
            self.n_pad = r_pad * 128
            self._loss_fn = jax.jit(self._make_tiled_fn())

    # ---------------------------------------------------------------- small N
    def _make_single_block_fn(self):
        batch_size, period = self.batch_size, self.period
        inv_total = self.inv_total

        def kernel(x_ref, t_ref, out_ref):
            x = x_ref[...]                                   # (B, period)
            t = t_ref[...]
            # Weight regenerated in-kernel: lane index IS the within-item rank,
            # so no modulo / division is needed at all.
            lane = lax.broadcasted_iota(jnp.int32, x.shape, 1)
            w = jnp.where(lane == 0, jnp.float32(0.0),
                          (period - lane).astype(jnp.float32)) * inv_total
            div = t - x                                      # VPU
            out_ref[0, 0] = jnp.sum(div * div * w)           # VPU mul + XLU reduce

        def loss_fn(p_input, p_target):
            # Natural (batch, period) layout: no padding, no packing, no stack.
            x = p_input.astype(jnp.float32).reshape(batch_size, period)
            t = p_target.astype(jnp.float32).reshape(batch_size, period)
            out = pl.pallas_call(
                kernel,
                out_shape=jax.ShapeDtypeStruct((1, 1), jnp.float32),
                grid=(1,),
                in_specs=[
                    pl.BlockSpec((batch_size, period), lambda i: (0, 0)),
                    pl.BlockSpec((batch_size, period), lambda i: (0, 0)),
                ],
                out_specs=pl.BlockSpec(memory_space=pltpu.SMEM),
                compiler_params=pltpu.CompilerParams(
                    dimension_semantics=("arbitrary",)),
            )(x, t)
            return out[0, 0]

        return loss_fn

    # ---------------------------------------------------------------- large N
    def _make_tiled_fn(self):
        n, n_pad = self.n, self.n_pad
        r_pad, chunk_rows, num_chunks = self.r_pad, self.chunk_rows, self.num_chunks
        period = self.period
        inv_total = self.inv_total
        inv_period = np.float32(1.0 / period)
        chunk_elems = chunk_rows * 128

        def kernel(x_ref, t_ref, out_ref, acc_ref):
            step = pl.program_id(0)

            @pl.when(step == 0)
            def _():
                acc_ref[...] = jnp.zeros_like(acc_ref)

            x = x_ref[...]                                   # (chunk_rows, 128)
            t = t_ref[...]

            # Flat element index of every lane in this tile.
            row = lax.broadcasted_iota(jnp.int32, x.shape, 0)
            lane = lax.broadcasted_iota(jnp.int32, x.shape, 1)
            idx = step * chunk_elems + row * 128 + lane

            # r = idx mod (S+1), computed via reciprocal-multiply + one-step fixup
            # (avoids integer-divide lowering; exact for idx < ~2^23 * guard).
            q = (idx.astype(jnp.float32) * inv_period).astype(jnp.int32)
            r = idx - q * period
            r = r + jnp.where(r < 0, period, 0)
            r = r - jnp.where(r >= period, period, 0)

            # Weight regenerated in-kernel; padded tail (idx >= n) masked to 0.
            w = jnp.where((r == 0) | (idx >= n), jnp.float32(0.0),
                          (period - r).astype(jnp.float32)) * inv_total

            div = t - x
            acc_ref[...] += div * div * w                    # pure VPU per step

            @pl.when(step == pl.num_programs(0) - 1)
            def _():
                out_ref[0, 0] = jnp.sum(acc_ref[...])        # single XLU reduce

        def loss_fn(p_input, p_target):
            def plane(v):
                v = v.astype(jnp.float32).reshape(-1)
                v = jnp.pad(v, (0, n_pad - n))               # zero pad (no stack)
                return v.reshape(r_pad, 128)

            x = plane(p_input)
            t = plane(p_target)
            out = pl.pallas_call(
                kernel,
                out_shape=jax.ShapeDtypeStruct((1, 1), jnp.float32),
                grid=(num_chunks,),
                in_specs=[
                    pl.BlockSpec((chunk_rows, 128), lambda i: (i, 0)),
                    pl.BlockSpec((chunk_rows, 128), lambda i: (i, 0)),
                ],
                out_specs=pl.BlockSpec(memory_space=pltpu.SMEM),
                scratch_shapes=[pltpu.VMEM((chunk_rows, 128), jnp.float32)],
                compiler_params=pltpu.CompilerParams(
                    dimension_semantics=("arbitrary",)),
            )(x, t)
            return out[0, 0]

        return loss_fn

    # ---------------------------------------------------------------- forward
    def __call__(self, p_input: jax.Array, p_target: jax.Array) -> jax.Array:
        # forward: trajs_mse_loss = WeightMSELoss(p_input, p_target, isReLU=False)
        #          loss = sum([trajs_mse_loss]) == trajs_mse_loss
        trajs_mse_loss = self._loss_fn(p_input, p_target)
        self.trajs_mse_loss = trajs_mse_loss                 # mirrors PyTorch attribute
        return trajs_mse_loss


if __name__ == "__main__":
    key = jax.random.PRNGKey(0)
    k1, k2, k3, k4 = jax.random.split(key, 4)

    # --- default small case (single-block fast path) ---
    batch_size, sampling_num = 2, 8
    n = batch_size * (1 + sampling_num)                      # 18 elements
    p_input = jax.random.uniform(k1, (n,), dtype=jnp.float32)
    p_target = jax.random.uniform(k2, (n,), dtype=jnp.float32)

    module = WeightedRankingLossPallas(batch_size, sampling_num)
    loss = module(p_input, p_target)
    jax.block_until_ready(loss)
    ref = jnp.sum((p_target - p_input) ** 2 * module.weight)
    assert jnp.allclose(loss, ref, rtol=1e-5, atol=1e-6), (loss, ref)

    # --- larger case exercising the tiled path (grid > 1, VMEM accumulator) ---
    bs2, sn2 = 512, 1023
    n2 = bs2 * (1 + sn2)                                     # 524288 -> 2 grid steps
    p_input2 = jax.random.uniform(k3, (n2,), dtype=jnp.float32)
    p_target2 = jax.random.uniform(k4, (n2,), dtype=jnp.float32)
    module2 = WeightedRankingLossPallas(bs2, sn2)
    loss2 = module2(p_input2, p_target2)
    jax.block_until_ready(loss2)
    ref2 = jnp.sum((p_target2 - p_input2) ** 2 * module2.weight)
    assert jnp.allclose(loss2, ref2, rtol=1e-4, atol=1e-6), (loss2, ref2)

    print("KERNEL_OK")
</pallas_src>

<mosaic_0001>
module attributes {stable_mosaic.version = 11 : i64} {
  func.func @kernel(%arg0: i32, %arg1: memref<2x9xf32, #tpu.memory_space<vmem>>, %arg2: memref<2x9xf32, #tpu.memory_space<vmem>>, %arg3: memref<1x1xf32, #tpu.memory_space<smem>>) attributes {dimension_semantics = [#tpu.dimension_semantics<arbitrary>], iteration_bounds = array<i64: 1>, scalar_prefetch = 0 : i64, scratch_operands = 0 : i64, tpu.core_type = #tpu.core_type<tc>, window_params = [{pipeline_mode = #tpu.pipeline_mode<synchronous>, transform_indices = @transform_0, window_bounds = array<i64: 2, 9>}, {pipeline_mode = #tpu.pipeline_mode<synchronous>, transform_indices = @transform_1, window_bounds = array<i64: 2, 9>}, {transform_indices = @transform_2, window_bounds = array<i64: 1, 1>}]} {
    %c0 = arith.constant 0 : index
    %c0_0 = arith.constant 0 : index
    %0 = vector.load %arg1[%c0, %c0_0] : memref<2x9xf32, #tpu.memory_space<vmem>>, vector<2x9xf32>
    %c0_1 = arith.constant 0 : index
    %c0_2 = arith.constant 0 : index
    %1 = vector.load %arg2[%c0_1, %c0_2] : memref<2x9xf32, #tpu.memory_space<vmem>>, vector<2x9xf32>
    %2 = tpu.iota {dimensions = array<i32: 1>} : vector<2x9xi32>
    %c0_i32 = arith.constant 0 : i32
    %3 = vector.broadcast %c0_i32 : i32 to vector<2x9xi32>
    %4 = arith.cmpi eq, %2, %3 : vector<2x9xi32>
    %c9_i32 = arith.constant 9 : i32
    %5 = vector.broadcast %c9_i32 : i32 to vector<2x9xi32>
    %6 = arith.subi %5, %2 : vector<2x9xi32>
    %7 = arith.sitofp %6 : vector<2x9xi32> to vector<2x9xf32>
    %cst = arith.constant 0.000000e+00 : f32
    %8 = vector.broadcast %cst : f32 to vector<2x9xf32>
    %9 = arith.select %4, %8, %7 : vector<2x9xi1>, vector<2x9xf32>
    %cst_3 = arith.constant 0.013888889 : f32
    %10 = vector.broadcast %cst_3 : f32 to vector<2x9xf32>
    %11 = arith.mulf %9, %10 : vector<2x9xf32>
    %12 = arith.subf %1, %0 : vector<2x9xf32>
    %13 = arith.mulf %12, %12 : vector<2x9xf32>
    %14 = arith.mulf %13, %11 : vector<2x9xf32>
    %15 = vector.shape_cast %14 : vector<2x9xf32> to vector<1x2x9xf32>
    %cst_4 = arith.constant dense<0.000000e+00> : vector<1xf32>
    %16 = vector.multi_reduction <add>, %15, %cst_4 [1, 2] : vector<1x2x9xf32> to vector<1xf32>
    %17 = vector.shape_cast %16 : vector<1xf32> to vector<1x1x1xf32>
    %18 = vector.extract %17[0, 0, 0] : f32 from vector<1x1x1xf32>
    %c0_5 = arith.constant 0 : index
    %c0_6 = arith.constant 0 : index
    %19 = memref.load %arg3[%c0_5, %c0_6] : memref<1x1xf32, #tpu.memory_space<smem>>
    memref.store %18, %arg3[%c0_5, %c0_6] : memref<1x1xf32, #tpu.memory_space<smem>>
    return
  }
  func.func @transform_0(%arg0: i32) -> (i32, i32) {
    %c0_i32 = arith.constant 0 : i32
    %c0_i32_0 = arith.constant 0 : i32
    %c0_i32_1 = arith.constant 0 : i32
    return %c0_i32, %c0_i32_0 : i32, i32
  }
  func.func @transform_1(%arg0: i32) -> (i32, i32) {
    %c0_i32 = arith.constant 0 : i32
    %c0_i32_0 = arith.constant 0 : i32
    %c0_i32_1 = arith.constant 0 : i32
    return %c0_i32, %c0_i32_0 : i32, i32
  }
  func.func @transform_2(%arg0: i32) -> (i32, i32) {
    %c0_i32 = arith.constant 0 : i32
    %c0_i32_0 = arith.constant 0 : i32
    %c0_i32_1 = arith.constant 0 : i32
    return %c0_i32, %c0_i32_0 : i32, i32
  }
}

</mosaic_0001>

<bundles_post_ra>
// kernel: loss_fn.1
= control target key start
LH: loop header
LB: loop body
LE: loop exit
PB: predicated region body
PF: predicated region fallthrough
CT: control target
= control target key end

     0   :  { %v14_v2 = vlaneseq  ;;  %s99_s0 = inlined_call_operand.vmem [shape: f32[2,9], index: 0, kind: input, shape index: {}]   ;;  %s100_s1 = inlined_call_operand.vmem [shape: f32[2,9], index: 1, kind: input, shape index: {}]   ;;  %s101_s2 = inlined_call_operand.hbm [shape: f32[1,1], index: 2, kind: output, shape index: {}]  }
   0x1   :  { %v12_v0 = vld [vmem:[%s99_s0] sm:$0x3] }
   0x2   :  { %v13_v1 = vld [vmem:[%s100_s1] sm:$0x3] }
   0x3   :  { %7 = vsyncpa [#allocation3], 0  ;;  %v15_v3 = vand.u32 127, %v14_v2  ;;  %v21_v4 = vsub.f32 %v13_v1, %v12_v0  ;;  %vm24_vm1 = vcmask 66560   ;;  %s53_s14 = scalar_lea.hbm %s101_s2, 16 }
   0x4   :  { %p54_p0 = scmp.ne.s32.totalorder %s101_s2, %s53_s14  ;;  %p57_p1 = scmp.lt.u32.totalorder %s53_s14, %s101_s2 }
   0x5   :  { %v17_v5 = vsub.s32 9, %v15_v3  ;;  %vm16_vm0 = vcmp.eq.s32.totalorder %v15_v3, 0  ;;  %v22_v7 = vmul.f32 %v21_v4, %v21_v4 }
   0x6   :  { %p59_p2 = pnand %p57_p1, %p54_p0 }
   0x7   :  { %v18_v6 = vcvt.s32.f32 %v17_v5 }
   0x9   :  { %v19_v8 = vsel %vm16_vm0, 0.0, %v18_v6 }
   0xa   :  { %v20_v9 = vmul.f32 0.013888889, %v19_v8 }
   0xc   :  { %v23_v10 = vmul.f32 %v22_v7, %v20_v9 }
   0xe   :  { %v25_v11 = vsel %vm24_vm1, %v23_v10, 0.0 }
   0xf   :  { %26 = vadd.xlane.f32.xlu0 %v25_v11 }
  0x9c   :  { %v27_v12 = vpop.xlane.xlu0 %26 }
  0x9d   :  { %v28_v13 = vrot.slane %v27_v12, 4 }
  0x9f   :  { %v29_v14 = vadd.f32 %v28_v13, %v27_v12 }
  0xa1   :  { %v30_v15 = vrot.slane %v29_v14, 2 }
  0xa3   :  { %v31_v16 = vadd.f32 %v30_v15, %v29_v14 }
  0xa5   :  { %v32_v17 = vrot.slane %v31_v16, 1 }
  0xa7   :  { %v33_v18 = vadd.f32 %v32_v17, %v31_v16 }
  0xa9   :  { %50 = vpush %v33_v18 }
  0xda   :  { %s51_s0 = spop %50 }
  0xdb   :  { %36 = sst [smem:[#allocation2]] %s51_s0 }
  0xdc   :  { %62 = shalt.err (!%p59_p2)
}
  0xdd   :  { %s65_s19 = smov [#allocation2]  }
  0xde   :  { %44 = dma.smem_to_hbm %s65_s19, 16, %s101_s2, [#allocation3]  }
  0xdf   :  { %63 = dma.done.wait [#allocation3], 16  }
  0xe0   :  { %64 = vsyncadd [#allocation3], 4294967280 }
  0xe1   :  { %48 = sfence }
  0xe2   :  { %49 = vsyncpa [#allocation3], 1 }

</bundles_post_ra>
